<compile_context>
chip_gen: v7x
topology: tpu7x:2x2x1
jax: 0.10.0
libtpu: 0.0.40
codegen_flags: <defaults>
</compile_context>

<pallas_src>
import functools

import jax
import jax.numpy as jnp
from jax.experimental import pallas as pl
from jax.experimental.pallas import tpu as pltpu

# ---------------- configuration (BaseViewTransform.__init__ args) -------------
IN_CHANNELS = 16        # unused: get_cam_feats is abstract in the base class
OUT_CHANNELS = 8        # C
IMAGE_SIZE = (32, 32)   # (iH, iW)
FEATURE_SIZE = (4, 4)   # (fH, fW)
XBOUND = (-4.0, 4.0, 1.0)     # -> nx[0] = 8
YBOUND = (-4.0, 4.0, 1.0)     # -> nx[1] = 8
ZBOUND = (-10.0, 10.0, 20.0)  # -> nx[2] = 1
DBOUND = (1.0, 5.0, 1.0)      # -> D = 4


def gen_dx_bx(xbound, ybound, zbound):
    dx = jnp.array([row[2] for row in (xbound, ybound, zbound)], jnp.float32)
    bx = jnp.array([row[0] + row[2] / 2.0 for row in (xbound, ybound, zbound)],
                   jnp.float32)
    nx = [int((row[1] - row[0]) / row[2]) for row in (xbound, ybound, zbound)]
    return dx, bx, nx


def create_frustum(image_size, feature_size, dbound):
    iH, iW = image_size
    fH, fW = feature_size
    ds = jnp.arange(dbound[0], dbound[1], dbound[2], dtype=jnp.float32)
    D = ds.shape[0]
    ds = jnp.broadcast_to(ds.reshape(D, 1, 1), (D, fH, fW))
    xs = jnp.broadcast_to(
        jnp.linspace(0.0, iW - 1, fW, dtype=jnp.float32).reshape(1, 1, fW),
        (D, fH, fW))
    ys = jnp.broadcast_to(
        jnp.linspace(0.0, iH - 1, fH, dtype=jnp.float32).reshape(1, fH, 1),
        (D, fH, fW))
    return jnp.stack((xs, ys, ds), -1)   # (D, fH, fW, 3)


# ------------------------------- Pallas kernel --------------------------------
def _lss_kernel(geo_ref, feats_ref, out_ref, *,
                c_out, nx, ny, nz, x0, y0, z0, inv_dx, inv_dy, inv_dz):
    # geo slab (28, KTOT) f32, lane axis = [b_local, camera, frustum point]:
    #   rows 0-2  : frustum (u, v, depth)
    #   rows 3-26 : per-(batch, camera) params, lane-replicated
    #   row  27   : per-lane voxel column offset (b_local * NVOX)
    geo = geo_ref[0]
    k_tot = geo.shape[1]
    v_tot = out_ref.shape[2]

    fx = geo[0:1, :]
    fy = geo[1:2, :]
    fz = geo[2:3, :]

    def prm(k):                       # (1, KTOT) lane-replicated parameter
        return geo[3 + k:4 + k, :]

    # ---- geometry, fully vectorized over the KTOT lane axis (f32 VPU) ----
    # undo image augmentation: inv(post_rots) @ (frustum - post_trans)
    px = fx - prm(9)
    py = fy - prm(10)
    pz = fz - prm(11)
    qx = prm(0) * px + prm(1) * py + prm(2) * pz
    qy = prm(3) * px + prm(4) * py + prm(5) * pz
    qz = prm(6) * px + prm(7) * py + prm(8) * pz

    # perspective un-projection: (u*d, v*d, d)
    sx = qx * qz
    sy = qy * qz
    sz = qz

    # R2 = extra_rots @ cam2lidar_rots @ inv(intrins)
    # t2 = extra_rots @ cam2lidar_trans + extra_trans
    rx = prm(12) * sx + prm(13) * sy + prm(14) * sz + prm(21)
    ry = prm(15) * sx + prm(16) * sy + prm(17) * sz + prm(22)
    rz = prm(18) * sx + prm(19) * sy + prm(20) * sz + prm(23)

    # voxelization: ((geom - (bx - dx/2)) * (1/dx)).long()  (trunc toward zero,
    # matching torch .long(); reciprocal multiply instead of a vector divide)
    ix = ((rx - x0) * inv_dx).astype(jnp.int32)
    iy = ((ry - y0) * inv_dy).astype(jnp.int32)
    iz = ((rz - z0) * inv_dz).astype(jnp.int32)
    kept = ((ix >= 0) & (ix < nx) & (iy >= 0) & (iy < ny)
            & (iz >= 0) & (iz < nz))
    voff = geo[27:28, :].astype(jnp.int32)          # block-diagonal batch offset
    vox = jnp.where(kept, voff + iz * (nx * ny) + ix * ny + iy, -1)  # (1, KTOT)

    # ---- scatter-mean BEV pool: one bf16 MXU matmul ----
    # Build the one-hot directly in the MXU-native (KTOT, VTOT) layout so the
    # canonical (M,K)@(K,N) contraction needs no relayout of the one-hot; only
    # the tiny int32 vox vector goes through the XLU.  Broadcast to 8 sublanes
    # first so the transpose operates on native (8, 128) granules.
    vox_col = jnp.transpose(jnp.broadcast_to(vox, (8, k_tot)), (1, 0))[:, 0:1]
    iota_v = jax.lax.broadcasted_iota(jnp.int32, (k_tot, v_tot), 1)
    onehot = (vox_col == iota_v).astype(jnp.bfloat16)        # (KTOT, VTOT)

    feats = feats_ref[0]                                      # (C+1, KTOT) bf16
    acc = jnp.dot(feats, onehot,
                  preferred_element_type=jnp.float32)         # (C+1, VTOT) f32

    sums = acc[:c_out, :]                                     # (C, VTOT)
    cnt = acc[c_out:c_out + 1, :]                             # (1, VTOT) count row
    inv = pl.reciprocal(jnp.maximum(cnt, 1.0), approx=True)   # EUP slot
    out_ref[0] = (sums * inv).astype(out_ref.dtype)


# ------------------------------- wrapper (glue) --------------------------------
def base_view_transform_forward(cam_feats, camera_intrinsics, camera2lidar,
                                img_aug_matrix, lidar_aug_matrix):
    B, N, D, fH, fW, C = cam_feats.shape
    P = D * fH * fW
    K = N * P

    _, _, nx = gen_dx_bx(XBOUND, YBOUND, ZBOUND)
    NXv, NYv, NZv = nx
    NVOX = NZv * NXv * NYv

    # Batch-fusion tile: fuse pairs of batches per grid step so the pooled output
    # is 128 lanes wide and the MXU contraction doubles; keep >=2 grid steps when
    # possible so v7x's two TensorCores both get work.
    B_TILE = 2 if (B % 2 == 0 and B >= 4) else 1
    G = B // B_TILE
    KTOT = B_TILE * K
    VTOT = B_TILE * NVOX

    intrins = camera_intrinsics[..., :3, :3]
    post_rots = img_aug_matrix[..., :3, :3]
    post_trans = img_aug_matrix[..., :3, 3]
    c2l_rots = camera2lidar[..., :3, :3]
    c2l_trans = camera2lidar[..., :3, 3]
    extra_rots = lidar_aug_matrix[..., :3, :3]
    extra_trans = lidar_aug_matrix[..., :3, 3]

    # small (B*N) 3x3 setup math stays in plain JAX
    inv_post = jnp.linalg.inv(post_rots)                         # (B, N, 3, 3)
    combine = c2l_rots @ jnp.linalg.inv(intrins)                 # (B, N, 3, 3)
    R2 = jnp.einsum('bij,bnjk->bnik', extra_rots, combine)       # (B, N, 3, 3)
    t2 = (jnp.einsum('bij,bnj->bni', extra_rots, c2l_trans)
          + extra_trans[:, None, :])                             # (B, N, 3)

    # per-(b, n) 24 params: [inv_post(9), post_trans(3), R2(9), t2(3)]
    params24 = jnp.concatenate(
        [inv_post.reshape(B, N, 9), post_trans.reshape(B, N, 3),
         R2.reshape(B, N, 9), t2.reshape(B, N, 3)],
        axis=-1).astype(jnp.float32)                             # (B, N, 24)

    # lane-replicate each param across its camera's P frustum points; lane order
    # inside a fused step is [b_local, camera, point]
    params_rep = jnp.broadcast_to(params24[..., None], (B, N, 24, P))
    params_rep = jnp.transpose(params_rep, (0, 2, 1, 3)).reshape(B, 24, K)
    params_rep = jnp.transpose(params_rep.reshape(G, B_TILE, 24, K),
                               (0, 2, 1, 3)).reshape(G, 24, KTOT)

    frustum = create_frustum(IMAGE_SIZE, FEATURE_SIZE, DBOUND)   # (D, fH, fW, 3)
    frust = frustum.reshape(P, 3).T                              # (3, P)
    frust_rep = jnp.broadcast_to(
        jnp.tile(frust, (1, B_TILE * N))[None], (G, 3, KTOT))    # (G, 3, KTOT)

    # per-lane voxel column offset for the block-diagonal one-hot
    voff = jnp.repeat(jnp.arange(B_TILE, dtype=jnp.float32) * float(NVOX), K)
    voff_rep = jnp.broadcast_to(voff[None, None, :], (G, 1, KTOT))

    geo_slab = jnp.concatenate([frust_rep, params_rep, voff_rep],
                               axis=1)                            # (G, 28, KTOT)

    # channels-last feats -> lane-dense (C+1, KTOT) slab with fused 'ones' count
    # row; bf16 MXU operands (no f32 promotion -> half the DMA bytes)
    feats_t = jnp.transpose(cam_feats.reshape(B, N, P, C),
                            (0, 3, 1, 2)).reshape(B, C, K)        # (B, C, K)
    feats_t = jnp.transpose(feats_t.reshape(G, B_TILE, C, K),
                            (0, 2, 1, 3)).reshape(G, C, KTOT)     # (G, C, KTOT)
    ones_row = jnp.ones((G, 1, KTOT), feats_t.dtype)
    feats_aug = jnp.concatenate([feats_t, ones_row],
                                axis=1).astype(jnp.bfloat16)      # (G, C+1, KTOT)

    kernel = functools.partial(
        _lss_kernel, c_out=C, nx=NXv, ny=NYv, nz=NZv,
        x0=float(XBOUND[0]), y0=float(YBOUND[0]), z0=float(ZBOUND[0]),
        inv_dx=1.0 / float(XBOUND[2]), inv_dy=1.0 / float(YBOUND[2]),
        inv_dz=1.0 / float(ZBOUND[2]))

    bev_t = pl.pallas_call(
        kernel,
        out_shape=jax.ShapeDtypeStruct((G, C, VTOT), jnp.float32),
        grid_spec=pltpu.PrefetchScalarGridSpec(
            num_scalar_prefetch=0,
            grid=(G,),                                 # one step per batch pair
            in_specs=[
                pl.BlockSpec((1, 28, KTOT), lambda g: (g, 0, 0)),
                pl.BlockSpec((1, C + 1, KTOT), lambda g: (g, 0, 0)),
            ],
            out_specs=pl.BlockSpec((1, C, VTOT), lambda g: (g, 0, 0)),
        ),
        compiler_params=pltpu.CompilerParams(
            dimension_semantics=("parallel",)),        # 2 steps -> 2 TCs on v7x
    )(geo_slab, feats_aug)

    # bev_t: (G, C, VTOT) with VTOT flattened as [b_local, z, x, y]
    # torch: bev_pool -> (B, C, Z, X, Y); final = cat(unbind(dim=2), 1) -> (B, Z*C, X, Y)
    bev = bev_t.reshape(G, C, B_TILE, NZv, NXv, NYv)
    final = jnp.transpose(bev, (0, 2, 3, 1, 4, 5)).reshape(B, NZv * C, NXv, NYv)
    return final


# --------------------------- pure-JAX reference --------------------------------
def reference_forward(cam_feats, camera_intrinsics, camera2lidar,
                      img_aug_matrix, lidar_aug_matrix):
    B, N, D, fH, fW, C = cam_feats.shape
    intrins = camera_intrinsics[..., :3, :3]
    post_rots = img_aug_matrix[..., :3, :3]
    post_trans = img_aug_matrix[..., :3, 3]
    c2l_rots = camera2lidar[..., :3, :3]
    c2l_trans = camera2lidar[..., :3, 3]
    extra_rots = lidar_aug_matrix[..., :3, :3]
    extra_trans = lidar_aug_matrix[..., :3, 3]

    frustum = create_frustum(IMAGE_SIZE, FEATURE_SIZE, DBOUND)
    points = frustum[None, None] - post_trans[:, :, None, None, None, :]
    points = jnp.einsum('bnij,bndhwj->bndhwi', jnp.linalg.inv(post_rots), points)
    points = jnp.concatenate(
        [points[..., :2] * points[..., 2:3], points[..., 2:3]], -1)
    combine = c2l_rots @ jnp.linalg.inv(intrins)
    points = jnp.einsum('bnij,bndhwj->bndhwi', combine, points)
    points = points + c2l_trans[:, :, None, None, None, :]
    points = jnp.einsum('bij,bndhwj->bndhwi', extra_rots, points)
    points = points + extra_trans[:, None, None, None, None, :]

    dx, bx, nx = gen_dx_bx(XBOUND, YBOUND, ZBOUND)
    NXv, NYv, NZv = nx
    NVOX = NZv * NXv * NYv
    geom = ((points - (bx - dx / 2.0)) / dx).astype(jnp.int32).reshape(B, -1, 3)
    feats = cam_feats.reshape(B, -1, C).astype(jnp.float32)
    kept = ((geom[..., 0] >= 0) & (geom[..., 0] < NXv)
            & (geom[..., 1] >= 0) & (geom[..., 1] < NYv)
            & (geom[..., 2] >= 0) & (geom[..., 2] < NZv))
    vox = jnp.where(kept,
                    geom[..., 2] * (NXv * NYv) + geom[..., 0] * NYv + geom[..., 1],
                    NVOX)
    onehot = jax.nn.one_hot(vox, NVOX + 1, dtype=jnp.float32)[..., :NVOX]
    sums = jnp.einsum('bpv,bpc->bvc', onehot, feats)
    cnts = jnp.sum(onehot, axis=1)[..., None]
    bev = (sums / jnp.maximum(cnts, 1.0)).reshape(B, NZv, NXv, NYv, C)
    return jnp.transpose(bev, (0, 1, 4, 2, 3)).reshape(B, NZv * C, NXv, NYv)


if __name__ == "__main__":
    B, N = 4, 2            # B=4 -> 2 fused grid steps of B_TILE=2 batches each
    fH, fW = FEATURE_SIZE
    D = int((DBOUND[1] - DBOUND[0]) / DBOUND[2])
    C = OUT_CHANNELS

    key = jax.random.PRNGKey(0)
    k1, k2, k3, k4 = jax.random.split(key, 4)

    # deterministic stand-in for get_cam_feats(img) output (abstract in base
    # class); backbone features are assumed bf16, consumed natively by the kernel
    cam_feats = jax.random.normal(
        k1, (B, N, D, fH, fW, C), jnp.float32).astype(jnp.bfloat16)

    f, cx, cy = 16.0, 16.0, 16.0
    K4 = jnp.array([[f, 0, cx, 0], [0, f, cy, 0],
                    [0, 0, 1, 0], [0, 0, 0, 1]], jnp.float32)
    camera_intrinsics = jnp.broadcast_to(K4, (B, N, 4, 4))

    eye4 = jnp.eye(4, dtype=jnp.float32)
    last_row = jnp.array([0.0, 0.0, 0.0, 1.0], jnp.float32)

    img_aug_matrix = eye4 + 0.02 * jax.random.normal(k2, (B, N, 4, 4), jnp.float32)
    img_aug_matrix = img_aug_matrix.at[..., 3, :].set(last_row)
    camera2lidar = eye4 + 0.05 * jax.random.normal(k3, (B, N, 4, 4), jnp.float32)
    camera2lidar = camera2lidar.at[..., 3, :].set(last_row)
    lidar_aug_matrix = eye4 + 0.02 * jax.random.normal(k4, (B, 4, 4), jnp.float32)
    lidar_aug_matrix = lidar_aug_matrix.at[..., 3, :].set(last_row)

    out = base_view_transform_forward(cam_feats, camera_intrinsics, camera2lidar,
                                      img_aug_matrix, lidar_aug_matrix)
    out = jax.block_until_ready(out)

    ref = reference_forward(cam_feats, camera_intrinsics, camera2lidar,
                            img_aug_matrix, lidar_aug_matrix)
    assert out.shape == ref.shape, (out.shape, ref.shape)
    # tolerance budget: pl.reciprocal(approx=True) ~2^-12 relative; bf16 inputs
    # are identical on both paths (one-hot 0/1 exact, f32 accumulation)
    assert jnp.allclose(out, ref, atol=2e-3, rtol=2e-3), \
        float(jnp.max(jnp.abs(out - ref)))
    print("KERNEL_OK")
</pallas_src>

<mosaic_0001>
module attributes {stable_mosaic.version = 11 : i64} {
  func.func @_lss_kernel(%arg0: i32, %arg1: memref<1x28x256xf32, #tpu.memory_space<vmem>>, %arg2: memref<1x9x256xbf16, #tpu.memory_space<vmem>>, %arg3: memref<1x8x128xf32, #tpu.memory_space<vmem>>) attributes {dimension_semantics = [#tpu.dimension_semantics<parallel>], iteration_bounds = array<i64: 2>, scalar_prefetch = 0 : i64, scratch_operands = 0 : i64, tpu.core_type = #tpu.core_type<tc>, window_params = [{transform_indices = @transform_0, window_bounds = array<i64: 1, 28, 256>}, {transform_indices = @transform_1, window_bounds = array<i64: 1, 9, 256>}, {transform_indices = @transform_2, window_bounds = array<i64: 1, 8, 128>}]} {
    %c0 = arith.constant 0 : index
    %c0_0 = arith.constant 0 : index
    %c0_1 = arith.constant 0 : index
    %0 = vector.load %arg1[%c0, %c0_0, %c0_1] : memref<1x28x256xf32, #tpu.memory_space<vmem>>, vector<1x28x256xf32>
    %1 = vector.shape_cast %0 : vector<1x28x256xf32> to vector<28x256xf32>
    %2 = vector.extract_strided_slice %1 {offsets = [0, 0], sizes = [1, 256], strides = [1, 1]} : vector<28x256xf32> to vector<1x256xf32>
    %3 = vector.extract_strided_slice %1 {offsets = [1, 0], sizes = [1, 256], strides = [1, 1]} : vector<28x256xf32> to vector<1x256xf32>
    %4 = vector.extract_strided_slice %1 {offsets = [2, 0], sizes = [1, 256], strides = [1, 1]} : vector<28x256xf32> to vector<1x256xf32>
    %5 = vector.extract_strided_slice %1 {offsets = [12, 0], sizes = [1, 256], strides = [1, 1]} : vector<28x256xf32> to vector<1x256xf32>
    %6 = arith.subf %2, %5 : vector<1x256xf32>
    %7 = vector.extract_strided_slice %1 {offsets = [13, 0], sizes = [1, 256], strides = [1, 1]} : vector<28x256xf32> to vector<1x256xf32>
    %8 = arith.subf %3, %7 : vector<1x256xf32>
    %9 = vector.extract_strided_slice %1 {offsets = [14, 0], sizes = [1, 256], strides = [1, 1]} : vector<28x256xf32> to vector<1x256xf32>
    %10 = arith.subf %4, %9 : vector<1x256xf32>
    %11 = vector.extract_strided_slice %1 {offsets = [3, 0], sizes = [1, 256], strides = [1, 1]} : vector<28x256xf32> to vector<1x256xf32>
    %12 = arith.mulf %11, %6 : vector<1x256xf32>
    %13 = vector.extract_strided_slice %1 {offsets = [4, 0], sizes = [1, 256], strides = [1, 1]} : vector<28x256xf32> to vector<1x256xf32>
    %14 = arith.mulf %13, %8 : vector<1x256xf32>
    %15 = arith.addf %12, %14 : vector<1x256xf32>
    %16 = vector.extract_strided_slice %1 {offsets = [5, 0], sizes = [1, 256], strides = [1, 1]} : vector<28x256xf32> to vector<1x256xf32>
    %17 = arith.mulf %16, %10 : vector<1x256xf32>
    %18 = arith.addf %15, %17 : vector<1x256xf32>
    %19 = vector.extract_strided_slice %1 {offsets = [6, 0], sizes = [1, 256], strides = [1, 1]} : vector<28x256xf32> to vector<1x256xf32>
    %20 = arith.mulf %19, %6 : vector<1x256xf32>
    %21 = vector.extract_strided_slice %1 {offsets = [7, 0], sizes = [1, 256], strides = [1, 1]} : vector<28x256xf32> to vector<1x256xf32>
    %22 = arith.mulf %21, %8 : vector<1x256xf32>
    %23 = arith.addf %20, %22 : vector<1x256xf32>
    %24 = vector.extract_strided_slice %1 {offsets = [8, 0], sizes = [1, 256], strides = [1, 1]} : vector<28x256xf32> to vector<1x256xf32>
    %25 = arith.mulf %24, %10 : vector<1x256xf32>
    %26 = arith.addf %23, %25 : vector<1x256xf32>
    %27 = vector.extract_strided_slice %1 {offsets = [9, 0], sizes = [1, 256], strides = [1, 1]} : vector<28x256xf32> to vector<1x256xf32>
    %28 = arith.mulf %27, %6 : vector<1x256xf32>
    %29 = vector.extract_strided_slice %1 {offsets = [10, 0], sizes = [1, 256], strides = [1, 1]} : vector<28x256xf32> to vector<1x256xf32>
    %30 = arith.mulf %29, %8 : vector<1x256xf32>
    %31 = arith.addf %28, %30 : vector<1x256xf32>
    %32 = vector.extract_strided_slice %1 {offsets = [11, 0], sizes = [1, 256], strides = [1, 1]} : vector<28x256xf32> to vector<1x256xf32>
    %33 = arith.mulf %32, %10 : vector<1x256xf32>
    %34 = arith.addf %31, %33 : vector<1x256xf32>
    %35 = arith.mulf %18, %34 : vector<1x256xf32>
    %36 = arith.mulf %26, %34 : vector<1x256xf32>
    %37 = vector.extract_strided_slice %1 {offsets = [15, 0], sizes = [1, 256], strides = [1, 1]} : vector<28x256xf32> to vector<1x256xf32>
    %38 = arith.mulf %37, %35 : vector<1x256xf32>
    %39 = vector.extract_strided_slice %1 {offsets = [16, 0], sizes = [1, 256], strides = [1, 1]} : vector<28x256xf32> to vector<1x256xf32>
    %40 = arith.mulf %39, %36 : vector<1x256xf32>
    %41 = arith.addf %38, %40 : vector<1x256xf32>
    %42 = vector.extract_strided_slice %1 {offsets = [17, 0], sizes = [1, 256], strides = [1, 1]} : vector<28x256xf32> to vector<1x256xf32>
    %43 = arith.mulf %42, %34 : vector<1x256xf32>
    %44 = arith.addf %41, %43 : vector<1x256xf32>
    %45 = vector.extract_strided_slice %1 {offsets = [24, 0], sizes = [1, 256], strides = [1, 1]} : vector<28x256xf32> to vector<1x256xf32>
    %46 = arith.addf %44, %45 : vector<1x256xf32>
    %47 = vector.extract_strided_slice %1 {offsets = [18, 0], sizes = [1, 256], strides = [1, 1]} : vector<28x256xf32> to vector<1x256xf32>
    %48 = arith.mulf %47, %35 : vector<1x256xf32>
    %49 = vector.extract_strided_slice %1 {offsets = [19, 0], sizes = [1, 256], strides = [1, 1]} : vector<28x256xf32> to vector<1x256xf32>
    %50 = arith.mulf %49, %36 : vector<1x256xf32>
    %51 = arith.addf %48, %50 : vector<1x256xf32>
    %52 = vector.extract_strided_slice %1 {offsets = [20, 0], sizes = [1, 256], strides = [1, 1]} : vector<28x256xf32> to vector<1x256xf32>
    %53 = arith.mulf %52, %34 : vector<1x256xf32>
    %54 = arith.addf %51, %53 : vector<1x256xf32>
    %55 = vector.extract_strided_slice %1 {offsets = [25, 0], sizes = [1, 256], strides = [1, 1]} : vector<28x256xf32> to vector<1x256xf32>
    %56 = arith.addf %54, %55 : vector<1x256xf32>
    %57 = vector.extract_strided_slice %1 {offsets = [21, 0], sizes = [1, 256], strides = [1, 1]} : vector<28x256xf32> to vector<1x256xf32>
    %58 = arith.mulf %57, %35 : vector<1x256xf32>
    %59 = vector.extract_strided_slice %1 {offsets = [22, 0], sizes = [1, 256], strides = [1, 1]} : vector<28x256xf32> to vector<1x256xf32>
    %60 = arith.mulf %59, %36 : vector<1x256xf32>
    %61 = arith.addf %58, %60 : vector<1x256xf32>
    %62 = vector.extract_strided_slice %1 {offsets = [23, 0], sizes = [1, 256], strides = [1, 1]} : vector<28x256xf32> to vector<1x256xf32>
    %63 = arith.mulf %62, %34 : vector<1x256xf32>
    %64 = arith.addf %61, %63 : vector<1x256xf32>
    %65 = vector.extract_strided_slice %1 {offsets = [26, 0], sizes = [1, 256], strides = [1, 1]} : vector<28x256xf32> to vector<1x256xf32>
    %66 = arith.addf %64, %65 : vector<1x256xf32>
    %cst = arith.constant -4.000000e+00 : f32
    %67 = vector.broadcast %cst : f32 to vector<1x256xf32>
    %68 = arith.subf %46, %67 : vector<1x256xf32>
    %cst_2 = arith.constant 1.000000e+00 : f32
    %69 = vector.broadcast %cst_2 : f32 to vector<1x256xf32>
    %70 = arith.mulf %68, %69 : vector<1x256xf32>
    %71 = arith.fptosi %70 : vector<1x256xf32> to vector<1x256xi32>
    %cst_3 = arith.constant -4.000000e+00 : f32
    %72 = vector.broadcast %cst_3 : f32 to vector<1x256xf32>
    %73 = arith.subf %56, %72 : vector<1x256xf32>
    %cst_4 = arith.constant 1.000000e+00 : f32
    %74 = vector.broadcast %cst_4 : f32 to vector<1x256xf32>
    %75 = arith.mulf %73, %74 : vector<1x256xf32>
    %76 = arith.fptosi %75 : vector<1x256xf32> to vector<1x256xi32>
    %cst_5 = arith.constant -1.000000e+01 : f32
    %77 = vector.broadcast %cst_5 : f32 to vector<1x256xf32>
    %78 = arith.subf %66, %77 : vector<1x256xf32>
    %cst_6 = arith.constant 5.000000e-02 : f32
    %79 = vector.broadcast %cst_6 : f32 to vector<1x256xf32>
    %80 = arith.mulf %78, %79 : vector<1x256xf32>
    %81 = arith.fptosi %80 : vector<1x256xf32> to vector<1x256xi32>
    %c0_i32 = arith.constant 0 : i32
    %82 = vector.broadcast %c0_i32 : i32 to vector<1x256xi32>
    %83 = arith.cmpi sge, %71, %82 : vector<1x256xi32>
    %c8_i32 = arith.constant 8 : i32
    %84 = vector.broadcast %c8_i32 : i32 to vector<1x256xi32>
    %85 = arith.cmpi slt, %71, %84 : vector<1x256xi32>
    %86 = arith.andi %83, %85 : vector<1x256xi1>
    %c0_i32_7 = arith.constant 0 : i32
    %87 = vector.broadcast %c0_i32_7 : i32 to vector<1x256xi32>
    %88 = arith.cmpi sge, %76, %87 : vector<1x256xi32>
    %89 = arith.andi %86, %88 : vector<1x256xi1>
    %c8_i32_8 = arith.constant 8 : i32
    %90 = vector.broadcast %c8_i32_8 : i32 to vector<1x256xi32>
    %91 = arith.cmpi slt, %76, %90 : vector<1x256xi32>
    %92 = arith.andi %89, %91 : vector<1x256xi1>
    %c0_i32_9 = arith.constant 0 : i32
    %93 = vector.broadcast %c0_i32_9 : i32 to vector<1x256xi32>
    %94 = arith.cmpi sge, %81, %93 : vector<1x256xi32>
    %95 = arith.andi %92, %94 : vector<1x256xi1>
    %c1_i32 = arith.constant 1 : i32
    %96 = vector.broadcast %c1_i32 : i32 to vector<1x256xi32>
    %97 = arith.cmpi slt, %81, %96 : vector<1x256xi32>
    %98 = arith.andi %95, %97 : vector<1x256xi1>
    %99 = vector.extract_strided_slice %1 {offsets = [27, 0], sizes = [1, 256], strides = [1, 1]} : vector<28x256xf32> to vector<1x256xf32>
    %100 = arith.fptosi %99 : vector<1x256xf32> to vector<1x256xi32>
    %c64_i32 = arith.constant 64 : i32
    %101 = vector.broadcast %c64_i32 : i32 to vector<1x256xi32>
    %102 = arith.muli %81, %101 : vector<1x256xi32>
    %103 = arith.addi %100, %102 : vector<1x256xi32>
    %c8_i32_10 = arith.constant 8 : i32
    %104 = vector.broadcast %c8_i32_10 : i32 to vector<1x256xi32>
    %105 = arith.muli %71, %104 : vector<1x256xi32>
    %106 = arith.addi %103, %105 : vector<1x256xi32>
    %107 = arith.addi %106, %76 : vector<1x256xi32>
    %c-1_i32 = arith.constant -1 : i32
    %108 = vector.broadcast %c-1_i32 : i32 to vector<1x256xi32>
    %109 = arith.select %98, %107, %108 : vector<1x256xi1>, vector<1x256xi32>
    %110 = vector.shape_cast %109 : vector<1x256xi32> to vector<1x256xi32>
    %111 = vector.broadcast %110 : vector<1x256xi32> to vector<8x256xi32>
    %112 = tpu.transpose %111, [1, 0] : vector<8x256xi32> -> vector<256x8xi32>
    %113 = vector.extract_strided_slice %112 {offsets = [0, 0], sizes = [256, 1], strides = [1, 1]} : vector<256x8xi32> to vector<256x1xi32>
    %114 = tpu.iota {dimensions = array<i32: 1>} : vector<256x128xi32>
    %115 = vector.broadcast %113 : vector<256x1xi32> to vector<256x128xi32>
    %116 = arith.cmpi eq, %115, %114 : vector<256x128xi32>
    %117 = arith.extui %116 : vector<256x128xi1> to vector<256x128xi32>
    %118 = arith.sitofp %117 : vector<256x128xi32> to vector<256x128xf32>
    %119 = arith.truncf %118 : vector<256x128xf32> to vector<256x128xbf16>
    %c0_11 = arith.constant 0 : index
    %c0_12 = arith.constant 0 : index
    %c0_13 = arith.constant 0 : index
    %120 = vector.load %arg2[%c0_11, %c0_12, %c0_13] : memref<1x9x256xbf16, #tpu.memory_space<vmem>>, vector<1x9x256xbf16>
    %121 = vector.shape_cast %120 : vector<1x9x256xbf16> to vector<9x256xbf16>
    %cst_14 = arith.constant dense<0.000000e+00> : vector<9x128xf32>
    %122 = tpu.matmul %121, %119, %cst_14 {dimension_numbers = #tpu.dot_dimension_numbers<[1], [0], [0], [1], [0, 0, 1, 1], [], []>} : vector<9x256xbf16>, vector<256x128xbf16>, vector<9x128xf32> -> vector<9x128xf32>
    %123 = vector.extract_strided_slice %122 {offsets = [0, 0], sizes = [8, 128], strides = [1, 1]} : vector<9x128xf32> to vector<8x128xf32>
    %124 = vector.extract_strided_slice %122 {offsets = [8, 0], sizes = [1, 128], strides = [1, 1]} : vector<9x128xf32> to vector<1x128xf32>
    %cst_15 = arith.constant 1.000000e+00 : f32
    %125 = vector.broadcast %cst_15 : f32 to vector<1x128xf32>
    %126 = arith.maximumf %124, %125 : vector<1x128xf32>
    %127 = tpu.reciprocal %126 {approx = true} : vector<1x128xf32> -> vector<1x128xf32>
    %128 = vector.broadcast %127 : vector<1x128xf32> to vector<8x128xf32>
    %129 = arith.mulf %123, %128 : vector<8x128xf32>
    %c0_16 = arith.constant 0 : index
    %c0_17 = arith.constant 0 : index
    %c0_18 = arith.constant 0 : index
    %130 = vector.load %arg3[%c0_16, %c0_17, %c0_18] : memref<1x8x128xf32, #tpu.memory_space<vmem>>, vector<1x8x128xf32>
    %131 = vector.shape_cast %130 : vector<1x8x128xf32> to vector<8x128xf32>
    %132 = vector.shape_cast %129 : vector<8x128xf32> to vector<1x8x128xf32>
    tpu.vector_store %arg3[%c0_16, %c0_17, %c0_18], %132 {strides = array<i32>} : memref<1x8x128xf32, #tpu.memory_space<vmem>>, vector<1x8x128xf32>,
    return
  }
  func.func @transform_0(%arg0: i32) -> (i32, i32, i32) {
    %c0_i32 = arith.constant 0 : i32
    %c0_i32_0 = arith.constant 0 : i32
    %c0_i32_1 = arith.constant 0 : i32
    return %arg0, %c0_i32, %c0_i32_0 : i32, i32, i32
  }
  func.func @transform_1(%arg0: i32) -> (i32, i32, i32) {
    %c0_i32 = arith.constant 0 : i32
    %c0_i32_0 = arith.constant 0 : i32
    %c0_i32_1 = arith.constant 0 : i32
    return %arg0, %c0_i32, %c0_i32_0 : i32, i32, i32
  }
  func.func @transform_2(%arg0: i32) -> (i32, i32, i32) {
    %c0_i32 = arith.constant 0 : i32
    %c0_i32_0 = arith.constant 0 : i32
    %c0_i32_1 = arith.constant 0 : i32
    return %arg0, %c0_i32, %c0_i32_0 : i32, i32, i32
  }
}

</mosaic_0001>

<bundles_post_ra>
// kernel: tpu_custom_call.1
= control target key start
LH: loop header
LB: loop body
LE: loop exit
PB: predicated region body
PF: predicated region fallthrough
CT: control target
= control target key end

     0   :  { %7 = vsyncpa [#allocation3], 0  ;;  %s1352_s0 = inlined_call_operand.vmem [shape: f32[2,28,256], index: 0, kind: input, shape index: {}]   ;;  %s1353_s1 = inlined_call_operand.vmem [shape: bf16[2,9,256], index: 1, kind: input, shape index: {}]   ;;  %s1354_s2 = inlined_call_operand.hbm [shape: f32[2,8,128], index: 2, kind: output, shape index: {}]  }
   0x1   :  { %9 = vsyncpa [#allocation3 + $0x1], 0  ;;  %s1142_s9 = smov 0   ;;  %s1144_s10 = smov 0  }
   0x2   :  { %s1146_s11 = smov 0   ;;  %s1148_s12 = smov 0  }
   0x3 LB: > { %s1163_s13 = sadd.s32 4294967295, %s1122_s12   ;;  %s887_s14 = sadd.s32 4294967294, %s1122_s12   ;;  %s1122_s12 = sphi %s1148_s12, %s1362_s12   ;;  %s1118_s11 = sphi %s1146_s11, %s1361_s11   ;;  %s1114_s10 = sphi %s1144_s10, %s1360_s10   ;;  %s1110_s9 = sphi %s1142_s9, %s1359_s9  }
   0x4   : > { %s1167_s15 = sadd.s32 1, %s1122_s12   ;;  %s74_s16 = sadd.s32 1, %s1118_s11 }
   0x5   : > { %s71_s17 = ssub.s32 %s1122_s12, %s1167_s15  ;;  %p84_p0 = scmp.ne.s32.totalorder %s1118_s11, %s1114_s10 }
   0x6   : > { %p72_p1 = scmp.eq.s32.totalorder %s71_s17, 0  ;;  %p85_p2 = scmp.eq.s32.totalorder %s1163_s13, 1 }
   0x7   : > { %p90_p3 = scmp.ne.s32.totalorder %s1114_s10, %s1110_s9  ;;  %p91_p4 = scmp.eq.s32.totalorder %s887_s14, 1 }
   0x8   : > { %s1178_s18 = scalar_select %p72_p1, %s1118_s11, %s74_s16  }
   0x9   : > { %p1180_p5 = por %p85_p2, %p84_p0  ;;  %p1184_p6 = por %p91_p4, %p90_p3 }
   0xa   : > { %p890_p7 = scmp.ge.s32.totalorder %s1122_s12, 1  ;;  %p125_p8 = scmp.lt.s32.totalorder %s1122_s12, 3 }
   0xc   : > { %p126_p9 = pnand %p890_p7, %p125_p8 }
   0xd   : > { %p152_p10 = scmp.lt.s32.totalorder (!%p126_p9), %s1163_s13, 1  ;;  %v1124_v0 = vmov (!%p126_p9), 0   ;;  %s149_s30 = sand.u32 (!%p126_p9), 1, %s1114_s10  }
   0xe   : > { %129 = sbr.rel (%p126_p9) target bundleno = 771 (0x303), region = 28  ;;  %1053 = vset.pattern.permute.xlu1 (!%p126_p9), %v1124_v0  ;;  %s891_s3 = sshll.u32 (!%p126_p9), %s149_s30, 3 }
   0xf   : > { %s969_s4 = sshll.u32 (!%p126_p9), %s1163_s13, 7  ;;  %s151_s5 = scalar_lea.vmem (!%p126_p9), [#allocation2], %s891_s3 }
  0x10   : > { %s816_s6 = sshll.u32 (!%p126_p9), %s151_s5, 4  ;;  %s1310_s14 = scalar_lea.hbm (!%p126_p9), %s1354_s2, %s969_s4  ;;  %s1312_s6 = int_to_ptr.vmem [resolvable:$true] %s816_s6 }
  0x11   : > { %s803_s16 = scalar_lea.sflag (!%p126_p9), [#allocation3], %s149_s30  ;;  %s1060_s17 = scalar_lea.vmem (!%p126_p9), %s1312_s6, 128 }
  0x12   : > { %p1061_p11 = scmp.ne.s32.totalorder (!%p126_p9), %s1312_s6, %s1060_s17 }
  0x14   : > { %p1062_p12 = pnand (!%p126_p9), %p1061_p11, %p1180_p5 }
  0x15   : > { %s1193_s21 = scalar_select %p152_p10, %s1163_s13, 1 }
  0x16   : > { %p1063_p13 = pneg %p1062_p12  ;;  %s1126_s13 = smov [#allocation2]  }
  0x17   : > { %s972_s22 = sshll.u32 %s1193_s21, 6  ;;  %s973_s26 = sshll.u32 %s1193_s21, 4 }
  0x18   : > { %s1199_s25 = scalar_lea.vmem %s1352_s0, %s972_s22  ;;  %s1249_s29 = scalar_lea.vmem %s1353_s1, %s973_s26 }
  0x19   : > { %v164_v1 = vld [vmem:[%s1199_s25 + $0x8] sm:$0xff]  ;;  %v166_v2 = vld [vmem:[%s1199_s25 + $0x18] sm:$0xff]  ;;  %v1204_v18 = vld [vmem:[%s1199_s25 + $0x10] sm:$0xff]  ;;  %s1064_s21 = sshll.u32 %s1126_s13, 4  ;;  %s1065_s21 = int_to_ptr.vmem [resolvable:$false] %s1064_s21 }
  0x1a   : > { %v174_v3 = vrot.slane %v166_v2, 4  ;;  %v173_v22 = vrot.slane %v1204_v18, 4  ;;  %v163_v26 = vld [vmem:[%s1199_s25] sm:$0xff]  ;;  %v168_v32 = vld [vmem:[%s1199_s25 + $0x28] sm:$0xff]  ;;  %v170_v46 = vld [vmem:[%s1199_s25 + $0x38] sm:$0xf]  ;;  %p1067_p0 = scmp.lt.s32.totalorder %s1312_s6, %s1065_s21 }
  0x1b   : > { %v372_v60 = vrot.slane %v170_v46, 5  ;;  %s1066_s22 = scalar_lea.vmem %s1065_s21, 256 }
  0x1c   : > { %v178_v4 = vsub.f32 %v164_v1, %v174_v3  ;;  %v177_v31 = vsub.f32 %v163_v26, %v173_v22  ;;  %p1068_p1 = scmp.lt.s32.totalorder %s1066_s22, %s1060_s17 }
  0x1e   : > { %v182_v5 = vrot.slane %v178_v4, 5  ;;  %v202_v6 = vrot.slane %v178_v4, 2  ;;  %v226_v7 = vrot.slane %v178_v4, 7  ;;  %v181_v44 = vrot.slane %v177_v31, 5  ;;  %p1069_p2 = por %p1068_p1, %p1067_p0 }
  0x1f   : > { %v225_v45 = vrot.slane %v177_v31, 7  ;;  %v201_v54 = vrot.slane %v177_v31, 2 }
  0x20   : > { %v186_v8 = vmul.f32 %v182_v5, %v164_v1  ;;  %v206_v9 = vmul.f32 %v202_v6, %v164_v1  ;;  %v216_v10 = vmul.f32 %v202_v6, %v166_v2  ;;  %v230_v11 = vmul.f32 %v226_v7, %v166_v2  ;;  %p1070_p3 = pnand %p1069_p2, %p1063_p13 }
  0x21   : > { %v185_v61 = vmul.f32 %v181_v44, %v163_v26  ;;  %v229_v62 = vmul.f32 %v225_v45, %v1204_v18  ;;  %v296_v1 = vrot.slane %v170_v46, 1  ;;  %v205_v7 = vmul.f32 %v201_v54, %v163_v26 }
  0x22   : > { %v190_v12 = vrot.slane %v186_v8, 1  ;;  %v210_v13 = vrot.slane %v206_v9, 1  ;;  %v196_v14 = vrot.slane %v186_v8, 2  ;;  %v220_v15 = vrot.slane %v216_v10, 2 }
  0x23   : > { %v234_v16 = vrot.slane %v230_v11, 1  ;;  %v240_v17 = vrot.slane %v230_v11, 2  ;;  %v233_v10 = vrot.slane %v229_v62, 1 }
  0x24   : > { %v194_v19 = vadd.f32 %v190_v12, %v186_v8  ;;  %v214_v20 = vadd.f32 %v210_v13, %v206_v9  ;;  %v189_v9 = vrot.slane %v185_v61, 1 }
  0x25   : > { %v238_v21 = vadd.f32 %v234_v16, %v230_v11 }
  0x26   : > { %v200_v23 = vadd.f32 %v196_v14, %v194_v19  ;;  %v224_v24 = vadd.f32 %v220_v15, %v214_v20  ;;  %v1010_v14 = vtrunc.f32 %v170_v46  ;;  %v215_v15 = vmul.f32 %v201_v54, %v1204_v18 }
  0x27   : > { %v244_v25 = vadd.f32 %v240_v17, %v238_v21  ;;  %v195_v19 = vrot.slane %v185_v61, 2  ;;  %v209_v20 = vrot.slane %v205_v7, 1  ;;  %v193_v22 = vadd.f32 %v189_v9, %v185_v61 }
  0x28   : > { %v1011_v31 = vcvt.f32.s32 %v1010_v14 }
  0x29   : > { %v248_v27 = vrot.slane %v244_v25, 6  ;;  %v254_v28 = vrot.slane %v244_v25, 3  ;;  %v322_v29 = vrot.slane %v244_v25, 5  ;;  %v358_v30 = vrot.slane %v244_v25, 2 }
  0x2a   : > { %v284_v35 = vmul.f32 %v244_v25, %v168_v32 }
  0x2b   : > { %v252_v33 = vmul.f32 %v248_v27, %v200_v23  ;;  %v258_v34 = vmul.f32 %v254_v28, %v224_v24  ;;  %v326_v36 = vmul.f32 %v322_v29, %v168_v32  ;;  %v362_v37 = vmul.f32 %v358_v30, %v168_v32 }
  0x2c   : > { %v288_v56 = vrot.slane %v284_v35, 2  ;;  %v237_v23 = vadd.f32 %v233_v10, %v229_v62  ;;  %v239_v24 = vrot.slane %v229_v62, 2  ;;  %v459_v28 = vlaneseq }
  0x2d   : > { %v262_v38 = vrot.slane %v252_v33, 4  ;;  %v270_v39 = vrot.slane %v258_v34, 6  ;;  %v302_v40 = vrot.slane %v252_v33, 1  ;;  %v308_v41 = vrot.slane %v258_v34, 3 }
  0x2e   : > { %v342_v42 = vrot.slane %v252_v33, 6  ;;  %v348_v43 = vmul.f32 %v258_v34, %v168_v32  ;;  %v366_v53 = vrot.slane %v362_v37, 2  ;;  %v330_v58 = vrot.slane %v326_v36, 2 }
  0x2f   : > { %v266_v47 = vmul.f32 %v262_v38, %v166_v2  ;;  %v274_v48 = vmul.f32 %v270_v39, %v168_v32  ;;  %v306_v49 = vmul.f32 %v302_v40, %v168_v32  ;;  %v312_v50 = vmul.f32 %v308_v41, %v168_v32 }
  0x30   : > { %v346_v51 = vmul.f32 %v342_v42, %v168_v32  ;;  %v352_v52 = vrot.slane %v348_v43, 1  ;;  %v336_v2 = vrot.slane %v170_v46, 7  ;;  %v219_v32 = vrot.slane %v215_v15, 2 }
  0x31   : > { %v278_v55 = vrot.slane %v274_v48, 1  ;;  %v316_v57 = vrot.slane %v312_v50, 1  ;;  %v199_v34 = vadd.f32 %v195_v19, %v193_v22  ;;  %v213_v35 = vadd.f32 %v209_v20, %v205_v7 }
  0x32   : > { %v356_v59 = vadd.f32 %v352_v52, %v346_v51  ;;  %v1212_v36 = vadd.f32 %v239_v24, %v237_v23 }
  0x33   : > { %v282_v63 = vadd.f32 %v278_v55, %v266_v47  ;;  %v320_v3 = vadd.f32 %v316_v57, %v306_v49  ;;  %v223_v47 = vadd.f32 %v219_v32, %v213_v35  ;;  %v1227_v55 = vshrl.u32 %v459_v28, 7 }
  0x34   : > { %v370_v4 = vadd.f32 %v366_v53, %v356_v59  ;;  %v247_v48 = vrot.slane %v1212_v36, 6  ;;  %v253_v49 = vrot.slane %v1212_v36, 3  ;;  %v167_v59 = vld [vmem:[%s1199_s25 + $0x20] sm:$0xff] }
  0x35   : > { %v292_v5 = vadd.f32 %v288_v56, %v282_v63  ;;  %v334_v6 = vadd.f32 %v330_v58, %v320_v3  ;;  %v461_v62 = vsub.s32 7, %v1227_v55  ;;  %v357_v3 = vrot.slane %v1212_v36, 2 }
  0x36   : > { %v376_v8 = vadd.f32 %v372_v60, %v370_v4  ;;  %v251_v56 = vmul.f32 %v247_v48, %v199_v34  ;;  %v257_v57 = vmul.f32 %v253_v49, %v223_v47  ;;  %v321_v4 = vrot.slane %v1212_v36, 5 }
  0x37   : > { %v300_v11 = vadd.f32 %v296_v1, %v292_v5  ;;  %v340_v12 = vadd.f32 %v336_v2, %v334_v6  ;;  %v283_v22 = vmul.f32 %v1212_v36, %v167_v59 }
  0x38   : > { %v901_v13 = vadd.f32 10.0, %v376_v8  ;;  %v307_v61 = vrot.slane %v257_v57, 3  ;;  %v341_v63 = vrot.slane %v251_v56, 6  ;;  %v347_v1 = vmul.f32 %v257_v57, %v167_v59 }
  0x39   : > { %v897_v16 = vadd.f32 4.0, %v300_v11  ;;  %v899_v17 = vadd.f32 4.0, %v340_v12  ;;  %v269_v6 = vrot.slane %v257_v57, 6  ;;  %v301_v7 = vrot.slane %v251_v56, 1 }
  0x3a   : > { %v388_v21 = vmul.f32 0.05, %v901_v13  ;;  %v311_v8 = vmul.f32 %v307_v61, %v167_v59  ;;  %v345_v10 = vmul.f32 %v341_v63, %v167_v59  ;;  %v351_v11 = vrot.slane %v347_v1, 1 }
  0x3b   : > { %v998_v25 = vtrunc.f32 %v897_v16  ;;  %v1002_v27 = vtrunc.f32 %v899_v17  ;;  %v361_v12 = vmul.f32 %v357_v3, %v167_v59  ;;  %v261_v13 = vrot.slane %v251_v56, 4 }
  0x3c   : > { %v1006_v26 = vtrunc.f32 %v388_v21  ;;  %v273_v14 = vmul.f32 %v269_v6, %v167_v59  ;;  %v305_v15 = vmul.f32 %v301_v7, %v167_v59  ;;  %v315_v16 = vrot.slane %v311_v8, 1  ;;  %v169_v21 = vld [vmem:[%s1199_s25 + $0x30] sm:$0xf] }
  0x3d   : > { %v999_v29 = vcvt.f32.s32 %v998_v25  ;;  %v1003_v30 = vcvt.f32.s32 %v1002_v27  ;;  %v325_v17 = vmul.f32 %v321_v4, %v167_v59  ;;  %v355_v19 = vadd.f32 %v351_v11, %v345_v10 }
  0x3e   : > { %v1007_v33 = vcvt.f32.s32 %v1006_v26  ;;  %v365_v20 = vrot.slane %v361_v12, 2  ;;  %v265_v23 = vmul.f32 %v261_v13, %v1204_v18  ;;  %v277_v24 = vrot.slane %v273_v14, 1 }
  0x3f   : > { %vm392_vm0 = vcmp.ge.s32.totalorder %v999_v29, 0  ;;  %vm394_vm1 = vcmp.lt.s32.totalorder %v999_v29, 8  ;;  %vm398_vm2 = vcmp.ge.s32.totalorder %v1003_v30, 0  ;;  %vm408_vm3 = vcmp.lt.s32.totalorder %v1003_v30, 8 }
  0x40   : > { %v400_v37 = vsel %vm398_vm2, 1, %v1124_v0  ;;  %v410_v38 = vsel %vm408_vm3, 1, %v1124_v0  ;;  %vm418_vm4 = vcmp.ge.s32.totalorder %v1007_v33, 0  ;;  %vm428_vm5 = vcmp.lt.s32.totalorder %v1007_v33, 1  ;;  %vm1216_vm6 = vmand %vm392_vm0, %vm394_vm1 }
  0x41   : > { %v402_v40 = vrot.slane %v400_v37, 3  ;;  %v412_v41 = vrot.slane %v410_v38, 3  ;;  %v420_v42 = vsel %vm418_vm4, 1, %v1124_v0  ;;  %v430_v43 = vsel %vm428_vm5, 1, %v1124_v0 }
  0x42   : > { %v422_v44 = vrot.slane %v420_v42, 6  ;;  %v440_v45 = vmul.u32 64, %v1007_v33  ;;  %v446_v46 = vmul.u32 8, %v999_v29  ;;  %v432_v50 = vrot.slane %v430_v43, 6 }
  0x43   : > { %vm404_vm7 = vcmp.ne.s32.totalorder %v402_v40, 0  ;;  %vm414_vm8 = vcmp.ne.s32.totalorder %v412_v41, 0  ;;  %v452_v54 = vrot.slane %v1003_v30, 7  ;;  %v319_v25 = vadd.f32 %v315_v16, %v305_v15 }
  0x44   : > { %vm406_vm9 = vmand %vm1216_vm6, %vm404_vm7  ;;  %v442_v51 = vrot.slane %v440_v45, 2  ;;  %v448_v52 = vrot.slane %v446_v46, 4  ;;  %vm424_vm11 = vcmp.ne.s32.totalorder %v422_v44, 0  ;;  %vm434_vm13 = vcmp.ne.s32.totalorder %v432_v50, 0 }
  0x45   : > { %vm416_vm10 = vmand %vm406_vm9, %vm414_vm8  ;;  %v329_v27 = vrot.slane %v325_v17, 2  ;;  %v369_v26 = vadd.f32 %v365_v20, %v355_v19  ;;  %v371_v29 = vrot.slane %v169_v21, 5  ;;  %v281_v30 = vadd.f32 %v277_v24, %v265_v23 }
  0x46   : > { %v444_v53 = vadd.s32 %v1011_v31, %v442_v51  ;;  %vm426_vm12 = vmand %vm416_vm10, %vm424_vm11  ;;  %v287_v31 = vrot.slane %v283_v22, 2  ;;  %v335_v33 = vrot.slane %v169_v21, 7  ;;  %v295_v37 = vrot.slane %v169_v21, 1 }
  0x47   : > { %vm436_vm14 = vmand %vm426_vm12, %vm434_vm13  ;;  %v333_v32 = vadd.f32 %v329_v27, %v319_v25  ;;  %v375_v34 = vadd.f32 %v371_v29, %v369_v26  ;;  %v1008_v48 = vtrunc.f32 %v169_v21 }
  0x48   : > { %v450_v58 = vadd.s32 %v448_v52, %v444_v53  ;;  %v291_v35 = vadd.f32 %v287_v31, %v281_v30 }
  0x49   : > { %v339_v38 = vadd.f32 %v335_v33, %v333_v32  ;;  %v900_v39 = vadd.f32 10.0, %v375_v34  ;;  %v1009_v52 = vcvt.f32.s32 %v1008_v48 }
  0x4a   : > { %v454_v60 = vadd.s32 %v452_v54, %v450_v58  ;;  %v299_v40 = vadd.f32 %v295_v37, %v291_v35 }
  0x4b   : > { %v898_v41 = vadd.f32 4.0, %v339_v38  ;;  %v387_v42 = vmul.f32 0.05, %v900_v39 }
  0x4c   : > { %v456_v2 = vrot.slane %v454_v60, 4  ;;  %v896_v36 = vadd.f32 4.0, %v299_v40 }
  0x4d   : > { %v1000_v43 = vtrunc.f32 %v898_v41  ;;  %v1004_v18 = vtrunc.f32 %v387_v42  ;;  %v1057_v41 = vld [vmem:[%s1249_s29 + $0x4] ss:$8 sps:$4 sm:$0x1f]  }
  0x4e   : > { %v458_v5 = vsel %vm436_vm14, %v456_v2, 4294967295  ;;  %v996_v44 = vtrunc.f32 %v896_v36  ;;  %785 = vmatprep.mubr.bf16.mxu0 %v1057_v41 }
  0x4f   : > { %v466_v9 = vrot.slane %v458_v5, %v461_v62  ;;  %v1001_v45 = vcvt.f32.s32 %v1000_v43  ;;  %v1005_v46 = vcvt.f32.s32 %v1004_v18  ;;  %v1253_v43 = vand.u32 127, %v459_v28 }
  0x50   : > { %v997_v47 = vcvt.f32.s32 %v996_v44  ;;  %v1125_v44 = vmov 1.0|1.0  }
  0x51   : > { %499 = vxpose.xlu0.b32.start.end [1/1] (short) %v466_v9, 128  ;;  %vm397_vm15 = vcmp.ge.s32.totalorder %v1001_v45, 0  ;;  %v439_v49 = vmul.u32 64, %v1005_v46  ;;  %vm407_vm0 = vcmp.lt.s32.totalorder %v1001_v45, 8  ;;  %vm417_vm1 = vcmp.ge.s32.totalorder %v1005_v46, 0 }
  0x52   : > { %v399_v50 = vsel %vm397_vm15, 1, %v1124_v0  ;;  %v445_v51 = vmul.u32 8, %v997_v47  ;;  %v409_v56 = vsel %vm407_vm0, 1, %v1124_v0  ;;  %vm391_vm2 = vcmp.ge.s32.totalorder %v997_v47, 0 }
  0x53   : > { %v441_v53 = vrot.slane %v439_v49, 2  ;;  %v401_v54 = vrot.slane %v399_v50, 3  ;;  %vm393_vm3 = vcmp.lt.s32.totalorder %v997_v47, 8  ;;  %v411_v58 = vrot.slane %v409_v56, 3 }
  0x54   : > { %v447_v57 = vrot.slane %v445_v51, 4  ;;  %v419_v59 = vsel %vm417_vm1, 1, %v1124_v0  ;;  %vm427_vm4 = vcmp.lt.s32.totalorder %v1005_v46, 1  ;;  %vm395_vm5 = vmand %vm391_vm2, %vm393_vm3  ;;  %v451_v3 = vrot.slane %v1001_v45, 7 }
  0x55   : > { %v443_v60 = vadd.s32 %v1009_v52, %v441_v53  ;;  %vm403_vm6 = vcmp.ne.s32.totalorder %v401_v54, 0  ;;  %v421_v61 = vrot.slane %v419_v59, 6  ;;  %v429_v63 = vsel %vm427_vm4, 1, %v1124_v0 }
  0x56   : > { %vm405_vm7 = vmand %vm395_vm5, %vm403_vm6  ;;  %vm413_vm8 = vcmp.ne.s32.totalorder %v411_v58, 0  ;;  %v431_v2 = vrot.slane %v429_v63, 6 }
  0x57   : > { %v449_v1 = vadd.s32 %v447_v57, %v443_v60  ;;  %vm415_vm9 = vmand %vm405_vm7, %vm413_vm8  ;;  %vm423_vm10 = vcmp.ne.s32.totalorder %v421_v61, 0 }
  0x58   : > { %vm425_vm11 = vmand %vm415_vm9, %vm423_vm10  ;;  %vm433_vm12 = vcmp.ne.s32.totalorder %v431_v2, 0 }
  0x59   : > { %v453_v4 = vadd.s32 %v451_v3, %v449_v1  ;;  %vm435_vm13 = vmand %vm425_vm11, %vm433_vm12 }
  0x5b   : > { %v455_v5 = vrot.slane %v453_v4, 4 }
  0x5d   : > { %v457_v6 = vsel %vm435_vm13, %v455_v5, 4294967295 }
  0x5e   : > { %v462_v7 = vrot.slane %v457_v6, %v461_v62 }
  0x8e   : > { %467 = vxpose.xlu0.b32.start.end [1/1] (short) %v462_v7, 128 }
  0xb7   : > { %1054 = vset.pattern.permute.xlu0 %v1124_v0 }
  0xd1   : > { %v515_v8 = vpop.trf.xlu0 }
  0xd2   : > { %582 = vperm.xlu1 %1053, %v515_v8  }
  0xd5   : > { %v516_v9 = vpop.trf.xlu0 }
  0xd9   : > { %v517_v10 = vpop.trf.xlu0 }
  0xdd   : > { %v518_v11 = vpop.trf.xlu0 }
  0xe1   : > { %v519_v12 = vpop.trf.xlu0 }
  0xe5   : > { %v520_v13 = vpop.trf.xlu0 }
  0xe9   : > { %v521_v14 = vpop.trf.xlu0 }
  0xed   : > { %v522_v15 = vpop.trf.xlu0 }
  0xf1   : > { %v523_v16 = vpop.trf.xlu0 }
  0xf5   : > { %v524_v17 = vpop.trf.xlu0 }
  0xf6   : > { %609 = vperm.xlu0 %1054, %v524_v17  }
  0xf9   : > { %v525_v19 = vpop.trf.xlu0 }
  0xfd   : > { %v526_v20 = vpop.trf.xlu0 }
 0x101   : > { %v527_v21 = vpop.trf.xlu0 }
 0x105   : > { %v528_v22 = vpop.trf.xlu0 }
 0x109   : > { %v529_v62 = vpop.trf.xlu0 }
 0x10d   : > { %v530_v23 = vpop.trf.xlu0 }
 0x111   : > { %v483_v24 = vpop.trf.xlu0 }
 0x112   : > { %534 = vperm.xlu1 %1053, %v483_v24  }
 0x115   : > { %v484_v0 = vpop.trf.xlu0 }
 0x116   : > { %585 = vperm.xlu1 %1053, %v516_v9  }
 0x119   : > { %v485_v25 = vpop.trf.xlu0 }
 0x11a   : > { %537 = vperm.xlu1 %1053, %v484_v0  }
 0x11d   : > { %v486_v27 = vpop.trf.xlu0 }
 0x11e   : > { %588 = vperm.xlu1 %1053, %v517_v10  }
 0x121   : > { %v487_v26 = vpop.trf.xlu0 }
 0x122   : > { %540 = vperm.xlu1 %1053, %v485_v25  }
 0x125   : > { %v488_v29 = vpop.trf.xlu0 }
 0x126   : > { %591 = vperm.xlu1 %1053, %v518_v11  }
 0x129   : > { %v489_v30 = vpop.trf.xlu0 }
 0x12a   : > { %543 = vperm.xlu1 %1053, %v486_v27  }
 0x12d   : > { %v490_v31 = vpop.trf.xlu0 }
 0x12e   : > { %594 = vperm.xlu1 %1053, %v519_v12   ;;  %v1055_v12 = vld [vmem:[%s1249_s29] ss:$8 sps:$4 sm:$0x1f]  }
 0x131   : > { %v491_v32 = vpop.trf.xlu0 }
 0x132   : > { %546 = vperm.xlu1 %1053, %v487_v26  }
 0x135   : > { %v492_v33 = vpop.trf.xlu0 }
 0x136   : > { %597 = vperm.xlu1 %1053, %v520_v13  }
 0x139   : > { %v493_v34 = vpop.trf.xlu0 }
 0x13a   : > { %549 = vperm.xlu1 %1053, %v488_v29  }
 0x13d   : > { %v494_v35 = vpop.trf.xlu0 }
 0x13e   : > { %600 = vperm.xlu1 %1053, %v521_v14  }
 0x141   : > { %v495_v37 = vpop.trf.xlu0 }
 0x142   : > { %552 = vperm.xlu1 %1053, %v489_v30  }
 0x145   : > { %v496_v38 = vpop.trf.xlu0 }
 0x146   : > { %603 = vperm.xlu1 %1053, %v522_v15  }
 0x149   : > { %v497_v39 = vpop.trf.xlu0 }
 0x14a   : > { %555 = vperm.xlu1 %1053, %v490_v31  }
 0x14d   : > { %v498_v40 = vpop.trf.xlu0 }
 0x14e   : > { %606 = vperm.xlu1 %1053, %v523_v16  }
 0x151   : > { %v583_v42 = vpop.permute.xlu1 %582 }
 0x152   : > { %558 = vperm.xlu1 %1053, %v491_v32   ;;  %vm645_vm14 = vcmp.eq.s32.totalorder %v583_v42, %v1253_v43 }
 0x156   : > { %561 = vperm.xlu1 %1053, %v492_v33  }
 0x15a   : > { %612 = vperm.xlu1 %1053, %v525_v19  }
 0x15e   : > { %564 = vperm.xlu1 %1053, %v493_v34  }
 0x162   : > { %615 = vperm.xlu1 %1053, %v526_v20  }
 0x166   : > { %567 = vperm.xlu1 %1053, %v494_v35  }
 0x16a   : > { %618 = vperm.xlu1 %1053, %v527_v21   ;;  %v798_v21 = vsub.s32 0, %v1227_v55 }
 0x16e   : > { %570 = vperm.xlu1 %1053, %v495_v37  }
 0x172   : > { %621 = vperm.xlu1 %1053, %v528_v22  }
 0x175   : > { %v610_v58 = vpop.permute.xlu0 %609 }
 0x176   : > { %573 = vperm.xlu1 %1053, %v496_v38  }
 0x17a   : > { %624 = vperm.xlu1 %1053, %v529_v62  }
 0x17e   : > { %576 = vperm.xlu1 %1053, %v497_v39  }
 0x182   : > { %627 = vperm.xlu1 %1053, %v530_v23  }
 0x186   : > { %579 = vperm.xlu1 %1053, %v498_v40  }
 0x191   : > { %v535_v36 = vpop.permute.xlu1 %534 }
 0x192   : > { %vm629_vm1 = vcmp.eq.s32.totalorder %v535_v36, %v1253_v43 }
 0x195   : > { %v586_v18 = vpop.permute.xlu1 %585 }
 0x196   : > { %vm646_vm15 = vcmp.eq.s32.totalorder %v586_v18, %v1253_v43 }
 0x197   : > { %vm952_vm0 = vmpackc.low %vm646_vm15, %vm645_vm14 }
 0x198   : > { %974 = vmatprep.subr.msk.bf16.mxu0 %vm952_vm0, %v1125_v44 }
 0x199   : > { %v538_v45 = vpop.permute.xlu1 %537 }
 0x19a   : > { %vm630_vm2 = vcmp.eq.s32.totalorder %v538_v45, %v1253_v43 }
 0x19b   : > { %vm936_vm3 = vmpackc.low %vm630_vm2, %vm629_vm1 }
 0x19c   : > { %975 = vmatpush3.bf16.msk.msra.mxu0 %vm936_vm3, %v1125_v44 }
 0x19d   : > { %v589_v46 = vpop.permute.xlu1 %588 }
 0x19e   : > { %vm647_vm4 = vcmp.eq.s32.totalorder %v589_v46, %v1253_v43 }
 0x1a1   : > { %v541_v28 = vpop.permute.xlu1 %540 }
 0x1a2   : > { %vm631_vm7 = vcmp.eq.s32.totalorder %v541_v28, %v1253_v43 }
 0x1a5   : > { %v592_v47 = vpop.permute.xlu1 %591 }
 0x1a6   : > { %vm648_vm5 = vcmp.eq.s32.totalorder %v592_v47, %v1253_v43 }
 0x1a7   : > { %vm954_vm6 = vmpackc.low %vm648_vm5, %vm647_vm4 }
 0x1a8   : > { %976 = vmatprep.subr.msk.bf16.mxu0 %vm954_vm6, %v1125_v44  ;;  %vm654_vm6 = vcmp.eq.s32.totalorder %v610_v58, %v1253_v43 }
 0x1a9   : > { %v544_v48 = vpop.permute.xlu1 %543 }
 0x1aa   : > { %vm632_vm8 = vcmp.eq.s32.totalorder %v544_v48, %v1253_v43 }
 0x1ab   : > { %vm938_vm9 = vmpackc.low %vm632_vm8, %vm631_vm7 }
 0x1ac   : > { %977 = vmatpush3.bf16.msk.msra.mxu0 %vm938_vm9, %v1125_v44 }
 0x1ad   : > { %v595_v49 = vpop.permute.xlu1 %594 }
 0x1ae   : > { %vm649_vm10 = vcmp.eq.s32.totalorder %v595_v49, %v1253_v43 }
 0x1b1   : > { %v547_v50 = vpop.permute.xlu1 %546 }
 0x1b2   : > { %vm633_vm13 = vcmp.eq.s32.totalorder %v547_v50, %v1253_v43 }
 0x1b5   : > { %v598_v51 = vpop.permute.xlu1 %597 }
 0x1b6   : > { %vm650_vm11 = vcmp.eq.s32.totalorder %v598_v51, %v1253_v43 }
 0x1b7   : > { %vm956_vm12 = vmpackc.low %vm650_vm11, %vm649_vm10 }
 0x1b8   : > { %978 = vmatprep.subr.msk.bf16.mxu0 %vm956_vm12, %v1125_v44 }
 0x1b9   : > { %v550_v52 = vpop.permute.xlu1 %549 }
 0x1ba   : > { %vm634_vm14 = vcmp.eq.s32.totalorder %v550_v52, %v1253_v43 }
 0x1bb   : > { %vm940_vm15 = vmpackc.low %vm634_vm14, %vm633_vm13 }
 0x1bc   : > { %979 = vmatpush3.bf16.msk.msra.mxu0 %vm940_vm15, %v1125_v44 }
 0x1bd   : > { %v601_v53 = vpop.permute.xlu1 %600 }
 0x1be   : > { %vm651_vm0 = vcmp.eq.s32.totalorder %v601_v53, %v1253_v43 }
 0x1c1   : > { %v553_v54 = vpop.permute.xlu1 %552 }
 0x1c2   : > { %vm635_vm3 = vcmp.eq.s32.totalorder %v553_v54, %v1253_v43 }
 0x1c5   : > { %v604_v56 = vpop.permute.xlu1 %603 }
 0x1c6   : > { %vm652_vm1 = vcmp.eq.s32.totalorder %v604_v56, %v1253_v43 }
 0x1c7   : > { %vm958_vm2 = vmpackc.low %vm652_vm1, %vm651_vm0 }
 0x1c8   : > { %980 = vmatprep.subr.msk.bf16.mxu0 %vm958_vm2, %v1125_v44 }
 0x1c9   : > { %v556_v57 = vpop.permute.xlu1 %555 }
 0x1ca   : > { %vm636_vm4 = vcmp.eq.s32.totalorder %v556_v57, %v1253_v43 }
 0x1cb   : > { %vm942_vm5 = vmpackc.low %vm636_vm4, %vm635_vm3 }
 0x1cc   : > { %981 = vmatpush3.bf16.msk.msra.mxu0 %vm942_vm5, %v1125_v44 }
 0x1cd   : > { %v607_v59 = vpop.permute.xlu1 %606 }
 0x1ce   : > { %vm653_vm7 = vcmp.eq.s32.totalorder %v607_v59, %v1253_v43 }
 0x1cf   : > { %vm960_vm8 = vmpackc.low %vm654_vm6, %vm653_vm7 }
 0x1d0   : > { %982 = vmatprep.subr.msk.bf16.mxu0 %vm960_vm8, %v1125_v44 }
 0x1d1   : > { %v559_v60 = vpop.permute.xlu1 %558 }
 0x1d2   : > { %vm637_vm9 = vcmp.eq.s32.totalorder %v559_v60, %v1253_v43 }
 0x1d5   : > { %v562_v61 = vpop.permute.xlu1 %561 }
 0x1d6   : > { %vm638_vm10 = vcmp.eq.s32.totalorder %v562_v61, %v1253_v43 }
 0x1d7   : > { %vm944_vm11 = vmpackc.low %vm638_vm10, %vm637_vm9 }
 0x1d8   : > { %983 = vmatpush3.bf16.msk.msra.mxu0 %vm944_vm11, %v1125_v44 }
 0x1d9   : > { %v613_v63 = vpop.permute.xlu1 %612 }
 0x1da   : > { %vm655_vm12 = vcmp.eq.s32.totalorder %v613_v63, %v1253_v43 }
 0x1dd   : > { %v565_v1 = vpop.permute.xlu1 %564 }
 0x1de   : > { %vm639_vm15 = vcmp.eq.s32.totalorder %v565_v1, %v1253_v43 }
 0x1e1   : > { %v616_v3 = vpop.permute.xlu1 %615 }
 0x1e2   : > { %vm656_vm13 = vcmp.eq.s32.totalorder %v616_v3, %v1253_v43 }
 0x1e3   : > { %vm962_vm14 = vmpackc.low %vm656_vm13, %vm655_vm12 }
 0x1e4   : > { %984 = vmatprep.subr.msk.bf16.mxu0 %vm962_vm14, %v1125_v44 }
 0x1e5   : > { %v568_v2 = vpop.permute.xlu1 %567 }
 0x1e6   : > { %vm640_vm0 = vcmp.eq.s32.totalorder %v568_v2, %v1253_v43 }
 0x1e7   : > { %vm946_vm1 = vmpackc.low %vm640_vm0, %vm639_vm15 }
 0x1e8   : > { %985 = vmatpush3.bf16.msk.msra.mxu0 %vm946_vm1, %v1125_v44 }
 0x1e9   : > { %v619_v4 = vpop.permute.xlu1 %618 }
 0x1ea   : > { %vm657_vm2 = vcmp.eq.s32.totalorder %v619_v4, %v1253_v43 }
 0x1ed   : > { %v571_v5 = vpop.permute.xlu1 %570 }
 0x1ee   : > { %vm641_vm5 = vcmp.eq.s32.totalorder %v571_v5, %v1253_v43 }
 0x1f1   : > { %v622_v6 = vpop.permute.xlu1 %621 }
 0x1f2   : > { %vm658_vm3 = vcmp.eq.s32.totalorder %v622_v6, %v1253_v43 }
 0x1f3   : > { %vm964_vm4 = vmpackc.low %vm658_vm3, %vm657_vm2 }
 0x1f4   : > { %986 = vmatprep.subr.msk.bf16.mxu0 %vm964_vm4, %v1125_v44 }
 0x1f5   : > { %v574_v7 = vpop.permute.xlu1 %573 }
 0x1f6   : > { %vm642_vm6 = vcmp.eq.s32.totalorder %v574_v7, %v1253_v43 }
 0x1f7   : > { %vm948_vm7 = vmpackc.low %vm642_vm6, %vm641_vm5 }
 0x1f8   : > { %987 = vmatpush3.bf16.msk.msra.mxu0 %vm948_vm7, %v1125_v44 }
 0x1f9   : > { %v625_v8 = vpop.permute.xlu1 %624 }
 0x1fa   : > { %vm659_vm8 = vcmp.eq.s32.totalorder %v625_v8, %v1253_v43 }
 0x1fd   : > { %v577_v9 = vpop.permute.xlu1 %576 }
 0x1fe   : > { %vm643_vm11 = vcmp.eq.s32.totalorder %v577_v9, %v1253_v43 }
 0x201   : > { %v628_v10 = vpop.permute.xlu1 %627 }
 0x202   : > { %vm660_vm9 = vcmp.eq.s32.totalorder %v628_v10, %v1253_v43 }
 0x203   : > { %vm966_vm10 = vmpackc.low %vm660_vm9, %vm659_vm8 }
 0x204   : > { %988 = vmatprep.subr.msk.bf16.mxu0 %vm966_vm10, %v1125_v44 }
 0x205   : > { %v580_v11 = vpop.permute.xlu1 %579 }
 0x206   : > { %vm644_vm12 = vcmp.eq.s32.totalorder %v580_v11, %v1253_v43 }
 0x207   : > { %vm950_vm13 = vmpackc.low %vm644_vm12, %vm643_vm11 }
 0x208   : > { %989 = vmatpush3.bf16.msk.msra.mxu0 %vm950_vm13, %v1125_v44 }
 0x20b   : > { %786 = vmatmul.mubr.bf16.vlgmr.msra.gmra.mrb[0].mxu0 %v1055_v12 }
 0x2de   : > { %v990_v13 = vpop.f32.mrb[0].mxu0 }
 0x2df   : > { %v991_v14 = vpop.f32.mrb[1].mxu0 }
 0x2e0   : > { %v992_v15 = vadd.f32 %v991_v14, %v990_v13  ;;  %v993_v16 = vpop.f32.mrb[2].mxu0 }
 0x2e1   : > { %v994_v17 = vpop.f32.mrb[3].mxu0 }
 0x2e2   : > { %v995_v19 = vadd.f32 %v994_v17, %v993_v16 }
 0x2e4   : > { %v794_v20 = vmax.f32 %v995_v19, 1.0 }
 0x2e6   : > { %1058 = vrcp.f32 %v794_v20 }
 0x2f0   : > { %v1059_v22 = vpop.eup %1058 }
 0x2f1   : > { %v799_v62 = vrot.slane %v1059_v22, %v798_v21 }
 0x2f3   : > { %v800_v23 = vmul.f32 %v992_v15, %v799_v62 }
 0x2f5   : > { %801 = vst [vmem:[%s151_s5] sm:$0xff] %v800_v23 }
 0x2f6   : > { %1073 = shalt.err (!%p1070_p3)
}
 0x2f7   : > { %s1074_s23 = scalar_lea.hbm %s1310_s14, 128  ;;  %s1078_s26 = scalar_lea.hbm %s1354_s2, 256 }
 0x2f8   : > { %p1075_p4 = scmp.ne.s32.totalorder %s1310_s14, %s1074_s23  ;;  %p1079_p9 = scmp.lt.u32.totalorder %s1310_s14, %s1354_s2 }
 0x2f9   : > { %p1080_p10 = scmp.lt.u32.totalorder %s1078_s26, %s1074_s23  ;;  %p1082_p12 = scmp.lt.u32.totalorder %s1074_s23, %s1310_s14 }
 0x2fa   : > { %p1076_p7 = pnand %p1075_p4, %p1180_p5 }
 0x2fb   : > { %p1081_p11 = por %p1080_p10, %p1079_p9 }
 0x2fc   : > { %p1077_p8 = pneg %p1076_p7 }
 0x2fd   : > { %p1083_p13 = por %p1082_p12, %p1081_p11 }
 0x2ff   : > { %p1084_p0 = pnand %p1083_p13, %p1077_p8 }
 0x301   : > { %1087 = shalt.err (!%p1084_p0)
}
 0x302   : > { %1012 = dma.vmem_to_hbm [thread:$0]  (%p1180_p5), %s1312_s6, 128, %s1310_s14, %s803_s16  }
 0x303 PF: > { %p1018_p1 = scmp.ge.s32.totalorder %s1122_s12, 2  ;;  %s828_s29 = sand.u32 1, %s1110_s9  }
 0x304   : > { %s829_s30 = scalar_lea.sflag [#allocation3], %s828_s29 }
 0x305   : > { %p1015_p2 = pnand %p1018_p1, %p1184_p6 }
 0x307   : > { %1105 = dma.done.wait (!%p1015_p2), %s829_s30, 128  }
 0x308   : > { %1107 = vsyncadd (!%p1015_p2), %s829_s30, 4294967168  ;;  %p12_p3 = scmp.ge.s32.totalorder %s1167_s15, 4   ;;  %s1359_s9 = smov %s1114_s10 }
 0x309   : > { %s1360_s10 = smov %s1118_s11  ;;  %s1361_s11 = smov %s1178_s18 }
 0x30a   : > { %s1362_s12 = smov %s1167_s15  ;;  %14 = sbr.rel (!%p12_p3) target bundleno = 3 (0x3), region = 66 }
 0x311   :  { %834 = vsyncpa [#allocation3], 1 }
 0x312   :  { %836 = vsyncpa [#allocation3 + $0x1], 1 }

</bundles_post_ra>
